<compile_context>
chip_gen: v5e
topology: v5e:2x2
jax: 0.10.0
libtpu: 0.0.40
codegen_flags: <defaults>
</compile_context>

<pallas_src>
import numpy as np
import jax
import jax.numpy as jnp
from jax.experimental import pallas as pl
from jax.experimental.pallas import tpu as pltpu


def _vmem_spec():
    return pl.BlockSpec(memory_space=pltpu.MemorySpace.VMEM)


def _smem_spec():
    return pl.BlockSpec(memory_space=pltpu.MemorySpace.SMEM)


def _round_up(x, m):
    return ((x + m - 1) // m) * m


def _choose_tile(dim, target, grain):
    """Largest multiple of `grain` that divides `dim` and is <= target.
    Falls back to the full dim (single tile) when no such divisor exists."""
    best = None
    d = grain
    while d <= min(dim, target):
        if dim % d == 0:
            best = d
        d += grain
    return best if best is not None else dim


# ----------------------------------------------------------------------------
# roi_heads.box_head (TwoMLPHead): fc6 -> relu -> fc7 -> relu
# fc6 is the only HBM-heavy op at real dims (12544x1024 w1 ~= 25 MiB bf16): it
# is a 2-D grid (output-column tiles x K tiles) so w1 streams through HBM
# exactly once in a few big tiles, and the column axis is "parallel" so v7x's
# second TensorCore gets real work.  fc7 (1024x1024, ~2 MiB) runs as a
# separate tiny single-shot kernel — no resident double-buffered blocks left
# inside the gridded kernel.
# ----------------------------------------------------------------------------
def fc6_kernel(x_ref, w1_ref, b1_ref, out_ref, acc_ref):
    k = pl.program_id(1)

    @pl.when(k == 0)
    def _init():
        acc_ref[...] = jnp.zeros_like(acc_ref)

    acc_ref[...] += jnp.dot(x_ref[...], w1_ref[...],
                            preferred_element_type=jnp.float32)

    @pl.when(k == pl.num_programs(1) - 1)
    def _finalize():
        out_ref[...] = jnp.maximum(acc_ref[...] + b1_ref[...], 0.0)


def fc7_kernel(h_ref, w2_ref, b2_ref, out_ref):
    w2 = w2_ref[...]
    h = h_ref[...].astype(w2.dtype)
    out_ref[...] = jnp.maximum(
        jnp.dot(h, w2, preferred_element_type=jnp.float32) + b2_ref[...], 0.0)


def box_head(x, w1, b1, w2, b2, *, tk=None, tn=None,
             compute_dtype=jnp.bfloat16, vmem_limit_bytes=24 * 1024 * 1024):
    n, din = x.shape
    dh1 = w1.shape[1]
    dh2 = w2.shape[1]

    # Weights should already be cached in compute_dtype at model-load time
    # (see __main__); only cast here if the caller did not.
    if w1.dtype != compute_dtype:
        w1 = w1.astype(compute_dtype)
    if w2.dtype != compute_dtype:
        w2 = w2.astype(compute_dtype)
    b1 = b1.astype(jnp.float32).reshape(1, dh1)
    b2 = b2.astype(jnp.float32).reshape(1, dh2)

    # Pad RoI rows to the bf16 sublane grain so MXU LHS and stores are unmasked.
    tm = _round_up(n, 16)
    xq = x.astype(compute_dtype)
    if tm != n:
        xq = jnp.pad(xq, ((0, tm - n), (0, 0)))

    # Few large K tiles (real DIN=12544 -> tk=1792, 7 steps) to amortize the
    # ~0.35 us per-grid-step cost; tn tiles give the megacore a parallel axis.
    if tk is None:
        tk = _choose_tile(din, 3136, 128)
    if tn is None:
        tn = _choose_tile(dh1, 512, 128)
    assert din % tk == 0 and dh1 % tn == 0

    h1 = pl.pallas_call(
        fc6_kernel,
        out_shape=jax.ShapeDtypeStruct((tm, dh1), jnp.float32),
        grid_spec=pltpu.PrefetchScalarGridSpec(
            num_scalar_prefetch=0,
            grid=(dh1 // tn, din // tk),
            in_specs=[
                pl.BlockSpec((tm, tk), lambda j, k: (0, k)),   # x: stream K
                pl.BlockSpec((tk, tn), lambda j, k: (k, j)),   # w1: each tile once
                pl.BlockSpec((1, tn), lambda j, k: (0, j)),    # b1 column slice
            ],
            out_specs=pl.BlockSpec((tm, tn), lambda j, k: (0, j)),
            scratch_shapes=[pltpu.VMEM((tm, tn), jnp.float32)],
        ),
        compiler_params=pltpu.CompilerParams(
            dimension_semantics=("parallel", "arbitrary"),
            vmem_limit_bytes=vmem_limit_bytes,
        ),
    )(xq, w1, b1)

    out = pl.pallas_call(
        fc7_kernel,
        out_shape=jax.ShapeDtypeStruct((tm, dh2), jnp.float32),
        in_specs=[_vmem_spec()] * 3,
        out_specs=_vmem_spec(),
    )(h1, w2, b2)
    return out[:n]


# ----------------------------------------------------------------------------
# Fused: _calculate_spatial_feats + _calculate_pose_feats + (act_logits +=
# act_logits2 ; Sigmoid) — one pallas_call, intermediates stay in VMEM/vregs.
# The wrapper gathers the tiny box/keypoint inputs with static pair-index
# tables (ordered i!=j pairs for spatial, h<o pairs for pose), so the kernel
# only computes consumed pairs and every output slab is a lane-dense store.
# ----------------------------------------------------------------------------
def pair_feats_kernel(imwh_ref, bi_ref, bj_ref, bh_ref, bo_ref,
                      kx_ref, ky_ref, l1_ref, l2_ref,
                      sp_ref, ap_ref, rp_ref, act_ref):
    eps = 1e-6
    w = imwh_ref[0]
    h = imwh_ref[1]
    # scalar reciprocals computed once; planes become multiplies
    inv_wp = 1.0 / (w + eps)
    inv_hp = 1.0 / (h + eps)
    inv_area = 1.0 / (w * h + eps)
    inv_w = 1.0 / w            # reference uses plain im_wh (no eps) here
    inv_h = 1.0 / h

    # spatial feats: box coords per ordered pair — coord on sublanes, pair on lanes
    x1i, y1i, x2i, y2i = (bi_ref[0:1, :], bi_ref[1:2, :],
                          bi_ref[2:3, :], bi_ref[3:4, :])
    x1j, y1j, x2j, y2j = (bj_ref[0:1, :], bj_ref[1:2, :],
                          bj_ref[2:3, :], bj_ref[3:4, :])
    inv_wj = pl.reciprocal(x2j - x1j + eps, approx=True)
    inv_hj = pl.reciprocal(y2j - y1j + eps, approx=True)
    planes = [
        # box_i with respect to the image
        x1i * inv_wp, y1i * inv_hp, x2i * inv_wp, y2i * inv_hp,
        (x2i - x1i) * (y2i - y1i) * inv_area,
        # box_j with respect to the image
        x1j * inv_wp, y1j * inv_hp, x2j * inv_wp, y2j * inv_hp,
        (x2j - x1j) * (y2j - y1j) * inv_area,
        # box_i with respect to box_j (reference has no eps on log numerators)
        (x1i - x1j) * inv_wj,
        (y1i - y1j) * inv_hj,
        jnp.log((x2i - x1i) * inv_wj),
        jnp.log((y2i - y1i) * inv_hj),
        # center offset: c_i - c_j / im_wh (reference precedence reproduced)
        (x1i + x2i) * 0.5 - ((x1j + x2j) * 0.5) * inv_w,
        (y1i + y2i) * 0.5 - ((y1j + y2j) * 0.5) * inv_h,
    ]
    sp_ref[...] = jnp.concatenate(planes, axis=0)    # one lane-dense (16, PP) store

    # pose feats for the h<o pairs only — pair on sublanes, keypoint on lanes
    kx = kx_ref[...]
    ky = ky_ref[...]
    sx = bh_ref[:, 0:1] + bh_ref[:, 2:3]             # x1_h + x2_h (no eps in ref)
    sy = bh_ref[:, 1:2] + bh_ref[:, 3:4]
    ap_ref[...] = jnp.stack([2.0 * kx * pl.reciprocal(sx, approx=True),
                             2.0 * ky * pl.reciprocal(sy, approx=True)], axis=0)
    cxo = (bo_ref[:, 0:1] + bo_ref[:, 2:3]) * 0.5
    cyo = (bo_ref[:, 1:2] + bo_ref[:, 3:4]) * 0.5
    rp_ref[...] = jnp.stack([(kx - cxo) * inv_w,
                             (ky - cyo) * inv_h], axis=0)

    # act_logits += act_logits2 ; Sigmoid (numerically stable single-exp form)
    z = l1_ref[...] + l2_ref[...]
    e = jnp.exp(-jnp.abs(z))
    r = pl.reciprocal(1.0 + e, approx=True)
    act_ref[...] = jnp.where(z >= 0.0, r, e * r)


def pair_feats(boxes, keypoints_xy, im_wh, act_logits, act_logits2):
    n = boxes.shape[0]
    kpts = keypoints_xy.shape[1]
    p, a = act_logits.shape

    # static pair index tables (the reference's diagonal-drop / triangular
    # selection is python list surgery; here it is a static gather of tiny inputs)
    ii, jj = np.nonzero(~np.eye(n, dtype=bool))                     # ordered i != j
    hh, oo = np.nonzero(np.triu(np.ones((n, n), dtype=bool), k=1))  # o > h
    assert p == hh.size, "expected one act-logit row per (h, o) pair"
    pp = ii.size                                                    # n*(n-1)

    pp_pad = _round_up(pp, 128)     # lane pad for the spatial-plane slab
    p_pad = _round_up(p, 16)        # sublane pad for pose / sigmoid rows
    k_pad = _round_up(kpts, 128)
    a_pad = _round_up(a, 128)

    # pad index tables by repeating pair 0 so padded rows/lanes stay finite;
    # the padded region is never consumed (sliced off below).
    ii_p = np.pad(ii, (0, pp_pad - pp))
    jj_p = np.pad(jj, (0, pp_pad - pp))
    hh_p = np.pad(hh, (0, p_pad - p))
    oo_p = np.pad(oo, (0, p_pad - p))

    boxes = boxes.astype(jnp.float32)
    bi = boxes[ii_p].T                                   # (4, pp_pad)
    bj = boxes[jj_p].T
    bh = boxes[hh_p]                                     # (p_pad, 4)
    bo = boxes[oo_p]
    kx = jnp.pad(keypoints_xy[hh_p, :, 0].astype(jnp.float32),
                 ((0, 0), (0, k_pad - kpts)))            # (p_pad, k_pad)
    ky = jnp.pad(keypoints_xy[hh_p, :, 1].astype(jnp.float32),
                 ((0, 0), (0, k_pad - kpts)))
    l1 = jnp.pad(act_logits.astype(jnp.float32),
                 ((0, p_pad - p), (0, a_pad - a)))
    l2 = jnp.pad(act_logits2.astype(jnp.float32),
                 ((0, p_pad - p), (0, a_pad - a)))
    imwh = jnp.asarray(im_wh, dtype=jnp.float32)

    sp, ap, rp, act = pl.pallas_call(
        pair_feats_kernel,
        out_shape=(
            jax.ShapeDtypeStruct((16, pp_pad), jnp.float32),        # spatial planes
            jax.ShapeDtypeStruct((2, p_pad, k_pad), jnp.float32),   # pose-to-human
            jax.ShapeDtypeStruct((2, p_pad, k_pad), jnp.float32),   # pose-to-obj off
            jax.ShapeDtypeStruct((p_pad, a_pad), jnp.float32),      # act probs
        ),
        in_specs=[_smem_spec()] + [_vmem_spec()] * 8,
        out_specs=(_vmem_spec(),) * 4,
    )(imwh, bi, bj, bh, bo, kx, ky, l1, l2)

    sp_feats = sp[:, :pp].T                                         # (n*(n-1), 16)
    ap_feats = jnp.stack([ap[0, :p, :kpts], ap[1, :p, :kpts]], axis=-1)  # (P, K, 2)
    rp_feats = jnp.stack([rp[0, :p, :kpts], rp[1, :p, :kpts]], axis=-1)
    act_probs = act[:p, :a]
    return sp_feats, ap_feats, rp_feats, act_probs


# ----------------------------------------------------------------------------
# demo
# ----------------------------------------------------------------------------
if __name__ == "__main__":
    key = jax.random.PRNGKey(0)
    keys = jax.random.split(key, 12)

    N = 8             # detections after NMS / _reconstruct_boxes (humans first)
    K = 17            # COCO keypoints
    A = 117           # HICO-DET action classes
    W_IMG, H_IMG = 64.0, 48.0
    DIN, DH1, DH2 = 1024, 512, 256   # scaled roi-feat dims (real: 12544 -> 1024 -> 1024)

    # TODO(synk): object/pose detector + NMS + _reconstruct_boxes are external
    # checkpointed models / python list surgery — synthesize clean detections.
    xy1 = jax.random.uniform(keys[0], (N, 2), minval=1.0,
                             maxval=jnp.array([W_IMG * 0.5, H_IMG * 0.5]))
    wh = jax.random.uniform(keys[1], (N, 2), minval=4.0,
                            maxval=jnp.array([W_IMG * 0.4, H_IMG * 0.4]))
    obj_boxes = jnp.concatenate([xy1, xy1 + wh], axis=1)           # (N, 4) xyxy
    obj_labels = jnp.array([1, 1] + list(range(2, N)), dtype=jnp.int32)
    pose_xy = jax.random.uniform(keys[2], (N, K, 2)) * jnp.array([W_IMG, H_IMG])

    # TODO(synk): ROI-Align (box_roi_pool) not implemented; synthesize pooled feats.
    roi_raw = jax.random.normal(keys[3], (N, DIN), dtype=jnp.float32)
    w1 = jax.random.normal(keys[4], (DIN, DH1), dtype=jnp.float32) * 0.05
    b1 = jax.random.normal(keys[5], (1, DH1), dtype=jnp.float32) * 0.01
    w2 = jax.random.normal(keys[6], (DH1, DH2), dtype=jnp.float32) * 0.05
    b2 = jax.random.normal(keys[7], (1, DH2), dtype=jnp.float32) * 0.01

    # Model-load-time weight cache: cast TwoMLPHead weights to bf16 ONCE
    # (perf review: avoids rematerializing a 25 MiB bf16 w1 copy per call).
    w1_bf16 = jax.block_until_ready(w1.astype(jnp.bfloat16))
    w2_bf16 = jax.block_until_ready(w2.astype(jnp.bfloat16))

    # roi_heads.box_head — column/K-tiled fc6 (bf16 MXU, f32 accumulator) plus
    # single-shot fc7. Small explicit tiles here exercise both grid axes at
    # demo dims; the defaults auto-pick tk=1792 / tn=512 at real dims.
    obj_boxes_feats = box_head(roi_raw, w1_bf16, b1, w2_bf16, b2,
                               tk=512, tn=256)                     # (N, DH2)

    # _get_word2vec — plain-JAX gather glue over a deterministic synthetic table
    w2v_table = jax.random.normal(keys[8], (91, 300), dtype=jnp.float32)
    o2v_feats = w2v_table[obj_labels]                              # (N, 300)

    # TODO(synk): vs_gats.AGRNN and pmn.PGception are external GNN/MLP models
    # loaded from checkpoints; synthesize their logits (one row per h<o pair).
    P = N * (N - 1) // 2
    act_logits = jax.random.normal(keys[9], (P, A), dtype=jnp.float32)
    act_logits2 = jax.random.normal(keys[10], (P, A), dtype=jnp.float32)

    # _calculate_spatial_feats + _calculate_pose_feats + (logits add, Sigmoid)
    # — one fused Pallas call
    sp_feats, ap_feats, rp_feats, act_probs = pair_feats(
        obj_boxes, pose_xy, (W_IMG, H_IMG), act_logits, act_logits2)

    # TODO(synk): vis_tool.vis_img drawing has no Pallas equivalent.
    jax.block_until_ready((obj_boxes_feats, o2v_feats, sp_feats,
                           ap_feats, rp_feats, act_probs))
    print("KERNEL_OK")
</pallas_src>

<mosaic_0001>
module attributes {stable_mosaic.version = 11 : i64} {
  func.func @fc6_kernel(%arg0: i32, %arg1: i32, %arg2: memref<16x512xbf16, #tpu.memory_space<vmem>>, %arg3: memref<512x256xbf16, #tpu.memory_space<vmem>>, %arg4: memref<1x256xf32, #tpu.memory_space<vmem>>, %arg5: memref<16x256xf32, #tpu.memory_space<vmem>>, %arg6: memref<16x256xf32, #tpu.memory_space<vmem>>) attributes {dimension_semantics = [#tpu.dimension_semantics<parallel>, #tpu.dimension_semantics<arbitrary>], iteration_bounds = array<i64: 2, 2>, scalar_prefetch = 0 : i64, scratch_operands = 1 : i64, tpu.core_type = #tpu.core_type<tc>, window_params = [{transform_indices = @transform_0, window_bounds = array<i64: 16, 512>}, {transform_indices = @transform_1, window_bounds = array<i64: 512, 256>}, {transform_indices = @transform_2, window_bounds = array<i64: 1, 256>}, {transform_indices = @transform_3, window_bounds = array<i64: 16, 256>}]} {
    %c0_i32 = arith.constant 0 : i32
    %0 = arith.cmpi eq, %arg1, %c0_i32 : i32
    %1 = arith.extui %0 : i1 to i32
    %c0_i32_0 = arith.constant 0 : i32
    %2 = arith.cmpi ne, %1, %c0_i32_0 : i32
    scf.if %2 {
      %cst_9 = arith.constant 0.000000e+00 : f32
      %12 = vector.broadcast %cst_9 : f32 to vector<16x256xf32>
      %c0_10 = arith.constant 0 : index
      %c0_11 = arith.constant 0 : index
      %13 = vector.load %arg6[%c0_10, %c0_11] : memref<16x256xf32, #tpu.memory_space<vmem>>, vector<16x256xf32>
      tpu.vector_store %arg6[%c0_10, %c0_11], %12 {strides = array<i32>} : memref<16x256xf32, #tpu.memory_space<vmem>>, vector<16x256xf32>,
    } else {
    }
    %c0 = arith.constant 0 : index
    %c0_1 = arith.constant 0 : index
    %3 = vector.load %arg6[%c0, %c0_1] : memref<16x256xf32, #tpu.memory_space<vmem>>, vector<16x256xf32>
    %c0_2 = arith.constant 0 : index
    %c0_3 = arith.constant 0 : index
    %4 = vector.load %arg2[%c0_2, %c0_3] : memref<16x512xbf16, #tpu.memory_space<vmem>>, vector<16x512xbf16>
    %c0_4 = arith.constant 0 : index
    %c0_5 = arith.constant 0 : index
    %5 = vector.load %arg3[%c0_4, %c0_5] : memref<512x256xbf16, #tpu.memory_space<vmem>>, vector<512x256xbf16>
    %cst = arith.constant dense<0.000000e+00> : vector<16x256xf32>
    %6 = tpu.matmul %4, %5, %cst {dimension_numbers = #tpu.dot_dimension_numbers<[1], [0], [0], [1], [0, 0, 1, 1], [], []>} : vector<16x512xbf16>, vector<512x256xbf16>, vector<16x256xf32> -> vector<16x256xf32>
    %7 = arith.addf %3, %6 : vector<16x256xf32>
    %c0_6 = arith.constant 0 : index
    %c0_7 = arith.constant 0 : index
    %8 = vector.load %arg6[%c0_6, %c0_7] : memref<16x256xf32, #tpu.memory_space<vmem>>, vector<16x256xf32>
    tpu.vector_store %arg6[%c0_6, %c0_7], %7 {strides = array<i32>} : memref<16x256xf32, #tpu.memory_space<vmem>>, vector<16x256xf32>,
    %c1_i32 = arith.constant 1 : i32
    %9 = arith.cmpi eq, %arg1, %c1_i32 : i32
    %10 = arith.extui %9 : i1 to i32
    %c0_i32_8 = arith.constant 0 : i32
    %11 = arith.cmpi ne, %10, %c0_i32_8 : i32
    scf.if %11 {
      %c0_9 = arith.constant 0 : index
      %c0_10 = arith.constant 0 : index
      %12 = vector.load %arg6[%c0_9, %c0_10] : memref<16x256xf32, #tpu.memory_space<vmem>>, vector<16x256xf32>
      %c0_11 = arith.constant 0 : index
      %c0_12 = arith.constant 0 : index
      %13 = vector.load %arg4[%c0_11, %c0_12] : memref<1x256xf32, #tpu.memory_space<vmem>>, vector<1x256xf32>
      %14 = vector.broadcast %13 : vector<1x256xf32> to vector<16x256xf32>
      %15 = arith.addf %12, %14 : vector<16x256xf32>
      %cst_13 = arith.constant 0.000000e+00 : f32
      %16 = vector.broadcast %cst_13 : f32 to vector<16x256xf32>
      %17 = arith.maximumf %15, %16 : vector<16x256xf32>
      %c0_14 = arith.constant 0 : index
      %c0_15 = arith.constant 0 : index
      %18 = vector.load %arg5[%c0_14, %c0_15] : memref<16x256xf32, #tpu.memory_space<vmem>>, vector<16x256xf32>
      tpu.vector_store %arg5[%c0_14, %c0_15], %17 {strides = array<i32>} : memref<16x256xf32, #tpu.memory_space<vmem>>, vector<16x256xf32>,
    } else {
    }
    return
  }
  func.func @transform_0(%arg0: i32, %arg1: i32) -> (i32, i32) {
    %c0_i32 = arith.constant 0 : i32
    %c0_i32_0 = arith.constant 0 : i32
    return %c0_i32, %arg1 : i32, i32
  }
  func.func @transform_1(%arg0: i32, %arg1: i32) -> (i32, i32) {
    %c0_i32 = arith.constant 0 : i32
    return %arg1, %arg0 : i32, i32
  }
  func.func @transform_2(%arg0: i32, %arg1: i32) -> (i32, i32) {
    %c0_i32 = arith.constant 0 : i32
    %c0_i32_0 = arith.constant 0 : i32
    return %c0_i32, %arg0 : i32, i32
  }
  func.func @transform_3(%arg0: i32, %arg1: i32) -> (i32, i32) {
    %c0_i32 = arith.constant 0 : i32
    %c0_i32_0 = arith.constant 0 : i32
    return %c0_i32, %arg0 : i32, i32
  }
}

</mosaic_0001>

<bundles_post_ra>
// kernel: tpu_custom_call.1
= control target key start
LH: loop header
LB: loop body
LE: loop exit
PB: predicated region body
PF: predicated region fallthrough
CT: control target
= control target key end

     0   :  { %s2264_s0 = inlined_call_operand.hbm [shape: bf16[16,1024], index: 0, kind: input, shape index: {}]   ;;  %s2265_s1 = inlined_call_operand.hbm [shape: bf16[1024,512], index: 1, kind: input, shape index: {}]   ;;  %s2266_s2 = inlined_call_operand.hbm [shape: f32[1,512], index: 2, kind: input, shape index: {}]   ;;  %s2267_s3 = inlined_call_operand.hbm [shape: f32[16,512], index: 3, kind: output, shape index: {}]  }
   0x1   :  { %2277 = sst [smem:[#allocation22_spill]] %s2264_s0 }
   0x2   :  { %2278 = sst [smem:[#allocation23_spill]] %s2265_s1 }
   0x3   :  { %2279 = sst [smem:[#allocation24_spill]] %s2267_s3 }
   0x4   :  { %8 = vsyncpa [#allocation4], 0 }
   0x5   :  { %10 = vsyncpa [#allocation4 + $0x1], 0 }
   0x6   :  { %11 = vsyncpa [#allocation7], 0 }
   0x7   :  { %13 = vsyncpa [#allocation7 + $0x1], 0 }
   0x8   :  { %14 = vsyncpa [#allocation5], 0 }
   0x9   :  { %16 = vsyncpa [#allocation5 + $0x1], 0  ;;  %s1792_s12 = smov 0   ;;  %s1794_s13 = smov 0  }
   0xa   :  { %s1796_s14 = smov 0   ;;  %s1798_s15 = smov 0  }
   0xb   :  { %s1800_s16 = smov 0   ;;  %s1802_s17 = smov 0  }
   0xc   :  { %s1804_s18 = smov 0   ;;  %s1806_s19 = smov 0  }
   0xd   :  { %s1808_s20 = smov 0   ;;  %s1810_s21 = smov 0  }
   0xe   :  { %s1812_s22 = smov 0   ;;  %s1814_s23 = smov 0  }
   0xf   :  { %s1816_s24 = smov 0   ;;  %s1818_s25 = smov 0  }
  0x10 LB: > { %2280 = sst [smem:[#allocation14_spill]] %s1729_s17  ;;  %s31_s26 = sadd.s32 1, %s1753_s23  ;;  %s1761_s25 = sphi %s1818_s25, %s22_s25   ;;  %s1757_s24 = sphi %s1816_s24, %s2310_s24   ;;  %s1753_s23 = sphi %s1814_s23, %s2309_s23   ;;  %s1749_s22 = sphi %s1812_s22, %s2308_s22   ;;  %s1745_s21 = sphi %s1810_s21, %s2318_s21   ;;  %s1741_s20 = sphi %s1808_s20, %s2306_s20   ;;  %s1737_s19 = sphi %s1806_s19, %s2317_s19   ;;  %s1733_s18 = sphi %s1804_s18, %s2316_s18   ;;  %s1729_s17 = sphi %s1802_s17, %s2304_s17   ;;  %s1725_s16 = sphi %s1800_s16, %s2315_s16   ;;  %s1721_s15 = sphi %s1798_s15, %s2314_s15   ;;  %s1717_s14 = sphi %s1796_s14, %s2313_s14   ;;  %s1713_s13 = sphi %s1794_s13, %s2312_s13   ;;  %s1709_s12 = sphi %s1792_s12, %s2311_s12  }
  0x11   : > { %2281 = sst [smem:[#allocation15_spill]] %s1741_s20  ;;  %s34_s27 = sadd.s32 1, %s1757_s24 }
  0x12   : > { %2282 = sst [smem:[#allocation16_spill]] %s1753_s23  ;;  %p32_p0 = scmp.ge.s32.totalorder %s31_s26, 2 }
  0x13   : > { %2283 = sst [smem:[#allocation17_spill]] %s1757_s24  ;;  %p49_p1 = scmp.eq.s32.totalorder %s1761_s25, 0 }
  0x14   : > { %p76_p2 = scmp.ne.s32.totalorder %s1729_s17, %s1725_s16  ;;  %s2320_s26 = smov (%p32_p0, %s31_s26), 0 }
  0x15   : > { %2284 = sst [smem:[#allocation18_spill]] %s2320_s26  ;;  %s2322_s27 = smov (!%p32_p0, %s34_s27), %s1757_s24 }
  0x16   : > { %s1875_s29 = ssub.s32 %s1753_s23, %s2320_s26  ;;  %p1879_p3 = por %p76_p2, %p49_p1 }
  0x17   : > { %p36_p4 = scmp.ge.s32.totalorder %s2322_s27, 2  ;;  %p39_p5 = scmp.eq.s32.totalorder %s1875_s29, 0 }
  0x18   : > { %p82_p6 = scmp.ne.s32.totalorder %s1725_s16, %s1721_s15  ;;  %p1394_p7 = scmp.lt.s32.totalorder %s1761_s25, 4 }
  0x19   : > { %s180_s4 = sand.u32 1, %s1761_s25   ;;  %s182_s5 = sand.u32 1, %s1729_s17  }
  0x1a   : > { %s1010_s6 = sshll.u32 %s182_s5, 9  ;;  %s2269_s7 = sshll.u32 %s1757_s24, 1 }
  0x1b   : > { %s1302_s8 = sshll.u32 %s1753_s23, 8  ;;  %s184_s9 = scalar_lea.vmem [#allocation6], %s1010_s6 }
  0x1c   : > { %s195_s10 = sshll.u32 %s184_s9, 4  ;;  %s190_s11 = sadd.s32 %s1302_s8, %s2269_s7  ;;  %s196_s10 = int_to_ptr.vmem [resolvable:$true] %s195_s10 }
  0x1d   : > { %s1014_s28 = sshll.u32 %s190_s11, 2  ;;  %p1384_p8 = pnand %p1394_p7, %p1879_p3 }
  0x1e   : > { %s2286_s1 = sld [smem:[#allocation23_spill]]  ;;  %s1901_s8 = scalar_lea.sflag [#allocation7], %s180_s4 }
  0x1f   : > { %s2271_s7 = smov 256   ;;  %s1764_s3 = smov 128  }
  0x20   : > { %s1765_s11 = smov 8   ;;  %p1017_p9 = scmp.ge.s32.totalorder %s1761_s25, 1 }
  0x21   : > { %p222_p10 = scmp.lt.s32.totalorder %s1761_s25, 5  ;;  %s41_s26 = sadd.s32 1, %s1741_s20 }
  0x22   : > { %p48_p12 = scmp.ne.s32.totalorder %s1741_s20, %s1737_s19  ;;  %p54_p13 = scmp.ne.s32.totalorder %s1737_s19, %s1733_s18 }
  0x23   : > { %p1907_p11 = pnand %p1017_p9, %p222_p10  ;;  %s158_s4 = sand.u32 1, %s1741_s20  }
  0x24   : > { %s192_s6 = scalar_lea.hbm %s2286_s1, %s1014_s28  ;;  %s1301_s5 = sshll.u32 %s1753_s23, 4 }
  0x25   : > { %s193_s9 = sshll.u32 %s192_s6, 4  ;;  %p50_p0 = por %p49_p1, %p48_p12  ;;  %s194_s9 = int_to_ptr.hbm [resolvable:$true] %s193_s9 }
  0x26   : > { %1386 = dma.hbm_to_vmem [thread:$0]  (!%p1384_p8), %s194_s9, 8192, %s196_s10, %s1901_s8, %s2271_s7, %s1764_s3, %s1765_s11  }
  0x27   : > { %s1915_s28 = scalar_select %p39_p5, %s1741_s20, %s41_s26  }
  0x28   : > { %s1007_s3 = sshll.u32 %s158_s4, 5  ;;  %s2289_s0 = sld [smem:[#allocation22_spill]] }
  0x29   : > { %2288 = sst [smem:[#allocation19_spill]] %s1915_s28  ;;  %s162_s26 = scalar_lea.vmem [#allocation3], %s1007_s3 }
  0x2a   : > { %s170_s7 = sshll.u32 %s162_s26, 4  ;;  %p1381_p2 = pnand %p1394_p7, %p50_p0  ;;  %s171_s7 = int_to_ptr.vmem [resolvable:$true] %s170_s7 }
  0x2b   : > { %s159_s1 = scalar_lea.sflag [#allocation4], %s158_s4  ;;  %s1766_s10 = smov 512  }
  0x2c   : > { %s2290_s6 = smov 256   ;;  %s1004_s3 = sadd.s32 4294967294, %s1761_s25  }
  0x2d   : > { %s2324_s27 = smov (%p36_p4, %s2322_s27), 0  ;;  %p102_p10 = scmp.ne.s32.totalorder %s1717_s14, %s1713_s13 }
  0x2e   : > { %s167_s9 = scalar_lea.hbm %s2289_s0, %s1301_s5  ;;  %s1767_s5 = smov 16  }
  0x2f   : > { %s168_s11 = sshll.u32 %s167_s9, 4  ;;  %s1932_s9 = sadd.s32 4294967295, %s1761_s25   ;;  %s169_s11 = int_to_ptr.hbm [resolvable:$true] %s168_s11 }
  0x30   : > { %1383 = dma.hbm_to_vmem [thread:$0]  (!%p1381_p2), %s169_s11, 512, %s171_s7, %s159_s1, %s1766_s10, %s2290_s6, %s1767_s5  }
  0x31   : > { %p55_p3 = scmp.eq.s32.totalorder %s1932_s9, 0  ;;  %2291 = sst [smem:[#allocation20_spill]] %s2324_s27 }
  0x32   : > { %s65_s4 = ssub.s32 %s1757_s24, %s2324_s27  ;;  %s95_s11 = sadd.s32 1, %s1717_s14 }
  0x33   : > { %p1946_p5 = por %p55_p3, %p54_p13  ;;  %p1955_p8 = por %p82_p6, %p55_p3 }
  0x34   : > { %s66_s26 = sor.u32 %s65_s4, %s1875_s29  ;;  %p93_p4 = scmp.eq.s32.totalorder %s65_s4, 0 }
  0x35   : > { %p67_p9 = scmp.eq.s32.totalorder %s66_s26, 0  ;;  %s2294_s10 = sadd.s32 1, %s1729_s17 }
  0x36   : > { %s1966_s18 = scalar_select %p93_p4, %s1717_s14, %s95_s11  }
  0x37   : > { %s1971_s5 = scalar_select %p67_p9, %s1729_s17, %s2294_s10  }
  0x38   : > { %p1975_p12 = por %p102_p10, %p49_p1  ;;  %p108_p6 = scmp.ne.s32.totalorder %s1713_s13, %s1709_s12 }
  0x39   : > { %2295 = sst [smem:[#allocation21_spill]] %s1971_s5  ;;  %p132_p13 = scmp.eq.s32.totalorder %s1932_s9, 3 }
  0x3a   : > { %p138_p0 = scmp.eq.s32.totalorder %s1004_s3, 3  ;;  %p1984_p2 = por %p108_p6, %p55_p3 }
  0x3b   : > { %s207_s6 = sand.u32 1, %s1717_s14   ;;  %p1989_p4 = por %p132_p13, %p102_p10 }
  0x3c   : > { %p1993_p9 = por %p138_p0, %p108_p6  ;;  %s1015_s26 = sshll.u32 %s207_s6, 1 }
  0x3d   : > { %s2300_s10 = sshll.u32 %s1757_s24, 1  ;;  %s209_s28 = scalar_lea.vmem [#allocation8], %s1015_s26 }
  0x3e   : > { %s213_s3 = scalar_lea.hbm %s2266_s2, %s2300_s10  ;;  %s217_s20 = sshll.u32 %s209_s28, 4  ;;  %s218_s20 = int_to_ptr.vmem [resolvable:$true] %s217_s20 }
  0x3f   : > { %s215_s23 = sshll.u32 %s213_s3, 4  ;;  %p1387_p1 = pnand %p1394_p7, %p1975_p12  ;;  %s216_s23 = int_to_ptr.hbm [resolvable:$true] %s215_s23 }
  0x40   : > { %226 = sbr.rel (%p1907_p11) target bundleno = 339 (0x153), region = 32  ;;  %s228_s6 = sand.u32 (!%p1907_p11), 1, %s1737_s19  }
  0x41   : > { %1389 = dma.hbm_to_vmem [thread:$0]  (!%p1387_p1), %s216_s23, 32, %s218_s20, %s1901_s8  }
  0x42   : > { %s1018_s24 = sshll.u32 (!%p1907_p11), %s228_s6, 5  ;;  %s229_s5 = scalar_lea.sflag (!%p1907_p11), [#allocation4], %s228_s6 }
  0x43   : > { %s2010_s17 = scalar_lea.vmem (!%p1907_p11), [#allocation3], %s1018_s24 }
  0x45   : > { %1692 = dma.done.wait (%p1946_p5), %s229_s5, 512  }
  0x46   : > { %1694 = vsyncadd (%p1946_p5), %s229_s5, 4294966784  ;;  %s238_s0 = sand.u32 1, %s1932_s9   ;;  %s240_s20 = sand.u32 1, %s1725_s16  }
  0x47   : > { %s1019_s23 = sshll.u32 %s240_s20, 9  ;;  %s239_s27 = scalar_lea.sflag [#allocation7], %s238_s0 }
  0x48   : > { %s2018_s8 = scalar_lea.vmem [#allocation6], %s1019_s23 }
  0x49   : > { %1696 = dma.done.wait (%p1955_p8), %s239_s27, 8192  }
  0x4a   : > { %1698 = vsyncadd (%p1955_p8), %s239_s27, 4294959104  ;;  %s2025_s24 = sand.u32 1, %s1713_s13  }
  0x4b   : > { %s1020_s30 = sshll.u32 %s2025_s24, 1 }
  0x4c   : > { %s2028_s28 = scalar_lea.vmem [#allocation8], %s1020_s30 }
  0x4d   : > { %1700 = dma.done.wait (%p1984_p2), %s239_s27, 32  }
  0x4e   : > { %1702 = vsyncadd (%p1984_p2), %s239_s27, 4294967264  ;;  %s1021_s9 = sshll.u32 %s2025_s24, 5  ;;  %p1022_p7 = scmp.ne.s32.totalorder %s1745_s21, 0 }
  0x4f   : > { %s2035_s1 = scalar_lea.vmem [#allocation9], %s1021_s9 }
  0x50   : > { %294 = sbr.rel (%p1022_p7) target bundleno = 90 (0x5a), region = 48 }
  0x55   : > { %v1768_v0 = vmov 0.0  }
  0x56   : > { %295 = vst [vmem:[#allocation2 + $0x10] sm:$0xff] %v1768_v0 }
  0x57   : > { %296 = vst [vmem:[#allocation2] sm:$0xff] %v1768_v0 }
  0x58   : > { %297 = vst [vmem:[#allocation2 + $0x18] sm:$0xff] %v1768_v0 }
  0x59   : > { %298 = vst [vmem:[#allocation2 + $0x8] sm:$0xff] %v1768_v0 }
  0x5a PF: > { %v1097_v1 = vld [vmem:[%s2018_s8 + $0x70] sm:$0xf]  ;;  %v1322_v2 = vld [vmem:[%s2018_s8 + $0x74] sm:$0xf0]  ;;  %v1089_v12 = vld [vmem:[%s2018_s8 + $0x60] sm:$0xf] }
  0x5b   : > { %v1161_v3 = vld [vmem:[%s2018_s8 + $0xf0] sm:$0xf]  ;;  %v1098_v4 = vor.u32 %v1322_v2, %v1097_v1  ;;  %v1338_v5 = vld [vmem:[%s2018_s8 + $0xf4] sm:$0xf0]  ;;  %v1320_v14 = vld [vmem:[%s2018_s8 + $0x64] sm:$0xf0] }
  0x5c   : > { %v1225_v6 = vld [vmem:[%s2018_s8 + $0x170] sm:$0xf]  ;;  %v1354_v7 = vld [vmem:[%s2018_s8 + $0x174] sm:$0xf0]  ;;  %v1162_v8 = vor.u32 %v1338_v5, %v1161_v3  ;;  %v1153_v15 = vld [vmem:[%s2018_s8 + $0xe0] sm:$0xf]  ;;  %v1090_v17 = vor.u32 %v1320_v14, %v1089_v12 }
  0x5d   : > { %v1226_v9 = vor.u32 %v1354_v7, %v1225_v6  ;;  %v1289_v10 = vld [vmem:[%s2018_s8 + $0x1f0] sm:$0xf]  ;;  %v1370_v11 = vld [vmem:[%s2018_s8 + $0x1f4] sm:$0xf0]  ;;  %711 = vmatpush.bf16.msra.mxu0 %v1098_v4  ;;  %v1336_v16 = vld [vmem:[%s2018_s8 + $0xe4] sm:$0xf0] }
  0x5e   : > { %v1290_v13 = vor.u32 %v1370_v11, %v1289_v10  ;;  %725 = vmatpush.bf16.msra.mxu1 %v1162_v8  ;;  %v1154_v18 = vor.u32 %v1336_v16, %v1153_v15  ;;  %v1217_v19 = vld [vmem:[%s2018_s8 + $0x160] sm:$0xf]  ;;  %v1352_v20 = vld [vmem:[%s2018_s8 + $0x164] sm:$0xf0]  ;;  %v1081_v24 = vld [vmem:[%s2018_s8 + $0x50] sm:$0xf] }
  0x5f   : > { %739 = vmatpush.bf16.msra.mxu2 %v1226_v9  ;;  %v1281_v21 = vld [vmem:[%s2018_s8 + $0x1e0] sm:$0xf]  ;;  %v1218_v22 = vor.u32 %v1352_v20, %v1217_v19  ;;  %v1368_v23 = vld [vmem:[%s2018_s8 + $0x1e4] sm:$0xf0]  ;;  %v1318_v25 = vld [vmem:[%s2018_s8 + $0x54] sm:$0xf0] }
  0x60   : > { %753 = vmatpush.bf16.msra.mxu3 %v1290_v13  ;;  %v1282_v26 = vor.u32 %v1368_v23, %v1281_v21  ;;  %v1145_v27 = vld [vmem:[%s2018_s8 + $0xd0] sm:$0xf]  ;;  %v1334_v28 = vld [vmem:[%s2018_s8 + $0xd4] sm:$0xf0]  ;;  %v1082_v30 = vor.u32 %v1318_v25, %v1081_v24  ;;  %v1073_v36 = vld [vmem:[%s2018_s8 + $0x40] sm:$0xf] }
  0x61   : > { %v1209_v29 = vld [vmem:[%s2018_s8 + $0x150] sm:$0xf]  ;;  %712 = vmatpush.bf16.msra.mxu0 %v1090_v17  ;;  %v1350_v31 = vld [vmem:[%s2018_s8 + $0x154] sm:$0xf0]  ;;  %v1146_v34 = vor.u32 %v1334_v28, %v1145_v27  ;;  %v1316_v37 = vld [vmem:[%s2018_s8 + $0x44] sm:$0xf0] }
  0x62   : > { %v1273_v32 = vld [vmem:[%s2018_s8 + $0x1d0] sm:$0xf]  ;;  %v1366_v33 = vld [vmem:[%s2018_s8 + $0x1d4] sm:$0xf0]  ;;  %726 = vmatpush.bf16.msra.mxu1 %v1154_v18  ;;  %v1210_v35 = vor.u32 %v1350_v31, %v1209_v29  ;;  %v1137_v38 = vld [vmem:[%s2018_s8 + $0xc0] sm:$0xf]  ;;  %v1074_v45 = vor.u32 %v1316_v37, %v1073_v36 }
  0x63   : > { %740 = vmatpush.bf16.msra.mxu2 %v1218_v22  ;;  %v1274_v39 = vor.u32 %v1366_v33, %v1273_v32  ;;  %v1332_v40 = vld [vmem:[%s2018_s8 + $0xc4] sm:$0xf0]  ;;  %v1201_v41 = vld [vmem:[%s2018_s8 + $0x140] sm:$0xf]  ;;  %v1065_v48 = vld [vmem:[%s2018_s8 + $0x30] sm:$0xf] }
  0x64   : > { %754 = vmatpush.bf16.msra.mxu3 %v1282_v26  ;;  %v1348_v42 = vld [vmem:[%s2018_s8 + $0x144] sm:$0xf0]  ;;  %v1265_v43 = vld [vmem:[%s2018_s8 + $0x1c0] sm:$0xf]  ;;  %v1138_v46 = vor.u32 %v1332_v40, %v1137_v38  ;;  %v1314_v49 = vld [vmem:[%s2018_s8 + $0x34] sm:$0xf0] }
  0x65   : > { %v1364_v44 = vld [vmem:[%s2018_s8 + $0x1c4] sm:$0xf0]  ;;  %713 = vmatpush.bf16.msra.mxu0 %v1082_v30  ;;  %v1202_v47 = vor.u32 %v1348_v42, %v1201_v41  ;;  %v1129_v50 = vld [vmem:[%s2018_s8 + $0xb0] sm:$0xf]  ;;  %v1330_v52 = vld [vmem:[%s2018_s8 + $0xb4] sm:$0xf0]  ;;  %v1066_v57 = vor.u32 %v1314_v49, %v1065_v48 }
  0x66   : > { %727 = vmatpush.bf16.msra.mxu1 %v1146_v34  ;;  %v1266_v51 = vor.u32 %v1364_v44, %v1265_v43  ;;  %v1193_v53 = vld [vmem:[%s2018_s8 + $0x130] sm:$0xf]  ;;  %v1346_v54 = vld [vmem:[%s2018_s8 + $0x134] sm:$0xf0]  ;;  %v1130_v58 = vor.u32 %v1330_v52, %v1129_v50  ;;  %v1057_v60 = vld [vmem:[%s2018_s8 + $0x20] sm:$0xf] }
  0x67   : > { %741 = vmatpush.bf16.msra.mxu2 %v1210_v35  ;;  %v1257_v55 = vld [vmem:[%s2018_s8 + $0x1b0] sm:$0xf]  ;;  %v1362_v56 = vld [vmem:[%s2018_s8 + $0x1b4] sm:$0xf0]  ;;  %v1194_v59 = vor.u32 %v1346_v54, %v1193_v53  ;;  %v1312_v61 = vld [vmem:[%s2018_s8 + $0x24] sm:$0xf0] }
  0x68   : > { %755 = vmatpush.bf16.msra.mxu3 %v1274_v39  ;;  %v1121_v62 = vld [vmem:[%s2018_s8 + $0xa0] sm:$0xf]  ;;  %v1258_v63 = vor.u32 %v1362_v56, %v1257_v55  ;;  %v1328_v0 = vld [vmem:[%s2018_s8 + $0xa4] sm:$0xf0]  ;;  %v1058_v5 = vor.u32 %v1312_v61, %v1057_v60  ;;  %v1049_v8 = vld [vmem:[%s2018_s8 + $0x10] sm:$0xf] }
  0x69   : > { %714 = vmatpush.bf16.msra.mxu0 %v1074_v45  ;;  %v1185_v1 = vld [vmem:[%s2018_s8 + $0x120] sm:$0xf]  ;;  %v1344_v2 = vld [vmem:[%s2018_s8 + $0x124] sm:$0xf0]  ;;  %v1122_v6 = vor.u32 %v1328_v0, %v1121_v62  ;;  %v1310_v9 = vld [vmem:[%s2018_s8 + $0x14] sm:$0xf0] }
  0x6a   : > { %728 = vmatpush.bf16.msra.mxu1 %v1138_v46  ;;  %v1249_v3 = vld [vmem:[%s2018_s8 + $0x1a0] sm:$0xf]  ;;  %v1360_v4 = vld [vmem:[%s2018_s8 + $0x1a4] sm:$0xf0]  ;;  %v1186_v7 = vor.u32 %v1344_v2, %v1185_v1  ;;  %v1113_v10 = vld [vmem:[%s2018_s8 + $0x90] sm:$0xf]  ;;  %v1050_v18 = vor.u32 %v1310_v9, %v1049_v8 }
  0x6b   : > { %742 = vmatpush.bf16.msra.mxu2 %v1202_v47  ;;  %v1250_v11 = vor.u32 %v1360_v4, %v1249_v3  ;;  %v1326_v12 = vld [vmem:[%s2018_s8 + $0x94] sm:$0xf0]  ;;  %v1177_v13 = vld [vmem:[%s2018_s8 + $0x110] sm:$0xf]  ;;  %v1041_v17 = vld [vmem:[%s2018_s8] sm:$0xf] }
  0x6c   : > { %756 = vmatpush.bf16.msra.mxu3 %v1266_v51  ;;  %v1342_v14 = vld [vmem:[%s2018_s8 + $0x114] sm:$0xf0]  ;;  %v1241_v15 = vld [vmem:[%s2018_s8 + $0x190] sm:$0xf]  ;;  %v1308_v19 = vld [vmem:[%s2018_s8 + $0x4] sm:$0xf0]  ;;  %v1114_v22 = vor.u32 %v1326_v12, %v1113_v10 }
  0x6d   : > { %715 = vmatpush.bf16.msra.mxu0 %v1066_v57  ;;  %v1358_v16 = vld [vmem:[%s2018_s8 + $0x194] sm:$0xf0]  ;;  %v1105_v20 = vld [vmem:[%s2018_s8 + $0x80] sm:$0xf]  ;;  %v1324_v21 = vld [vmem:[%s2018_s8 + $0x84] sm:$0xf0]  ;;  %v1178_v23 = vor.u32 %v1342_v14, %v1177_v13  ;;  %v1042_v34 = vor.u32 %v1308_v19, %v1041_v17 }
  0x6e   : > { %729 = vmatpush.bf16.msra.mxu1 %v1130_v58  ;;  %v1169_v24 = vld [vmem:[%s2018_s8 + $0x100] sm:$0xf]  ;;  %v1340_v25 = vld [vmem:[%s2018_s8 + $0x104] sm:$0xf0]  ;;  %v1242_v27 = vor.u32 %v1358_v16, %v1241_v15  ;;  %v1321_v29 = vld [vmem:[%s2018_s8 + $0x74] sm:$0xf]  ;;  %v1106_v38 = vor.u32 %v1324_v21, %v1105_v20 }
  0x6f   : > { %743 = vmatpush.bf16.msra.mxu2 %v1194_v59  ;;  %v1233_v26 = vld [vmem:[%s2018_s8 + $0x180] sm:$0xf]  ;;  %v1356_v28 = vld [vmem:[%s2018_s8 + $0x184] sm:$0xf0]  ;;  %v1099_v30 = vld [vmem:[%s2018_s8 + $0x78] sm:$0xf0]  ;;  %v1170_v39 = vor.u32 %v1340_v25, %v1169_v24 }
  0x70   : > { %757 = vmatpush.bf16.msra.mxu3 %v1258_v63  ;;  %v1337_v31 = vld [vmem:[%s2018_s8 + $0xf4] sm:$0xf]  ;;  %v1163_v32 = vld [vmem:[%s2018_s8 + $0xf8] sm:$0xf0]  ;;  %v1319_v40 = vld [vmem:[%s2018_s8 + $0x64] sm:$0xf]  ;;  %v1234_v44 = vor.u32 %v1356_v28, %v1233_v26  ;;  %v1102_v45 = vor.u32 %v1321_v29, %v1099_v30 }
  0x71   : > { %716 = vmatpush.bf16.msra.mxu0 %v1058_v5  ;;  %v1353_v33 = vld [vmem:[%s2018_s8 + $0x174] sm:$0xf]  ;;  %v1227_v35 = vld [vmem:[%s2018_s8 + $0x178] sm:$0xf0]  ;;  %v1091_v41 = vld [vmem:[%s2018_s8 + $0x68] sm:$0xf0]  ;;  %v1166_v50 = vor.u32 %v1337_v31, %v1163_v32 }
  0x72   : > { %730 = vmatpush.bf16.msra.mxu1 %v1122_v6  ;;  %v1369_v36 = vld [vmem:[%s2018_s8 + $0x1f4] sm:$0xf]  ;;  %v1291_v37 = vld [vmem:[%s2018_s8 + $0x1f8] sm:$0xf0]  ;;  %v1033_v42 = vld [vmem:[%s2010_s17 + $0x8] sm:$0xf]  ;;  %v1230_v51 = vor.u32 %v1353_v33, %v1227_v35  ;;  %v1094_v0 = vor.u32 %v1319_v40, %v1091_v41 }
  0x73   : > { %744 = vmatpush.bf16.msra.mxu2 %v1186_v7  ;;  %v1306_v43 = vld [vmem:[%s2010_s17 + $0x14] sm:$0xf0]  ;;  %v1335_v46 = vld [vmem:[%s2018_s8 + $0xe4] sm:$0xf]  ;;  %v1155_v47 = vld [vmem:[%s2018_s8 + $0xe8] sm:$0xf0]  ;;  %v1294_v55 = vor.u32 %v1369_v36, %v1291_v37 }
  0x74   : > { %758 = vmatpush.bf16.msra.mxu3 %v1250_v11  ;;  %v1351_v48 = vld [vmem:[%s2018_s8 + $0x164] sm:$0xf]  ;;  %v1219_v49 = vld [vmem:[%s2018_s8 + $0x168] sm:$0xf0]  ;;  %v1035_v53 = vld [vmem:[%s2010_s17 + $0x18] sm:$0xf0]  ;;  %v2121_v56 = vor.u32 %v1306_v43, %v1033_v42  ;;  %v1158_v2 = vor.u32 %v1335_v46, %v1155_v47 }
  0x75   : > { %717 = vmatpush.bf16.msra.mxu0 %v1050_v18  ;;  %v1304_v52 = vld [vmem:[%s2010_s17 + $0xc] sm:$0xf]  ;;  %v1025_v54 = vld [vmem:[%s2010_s17] sm:$0xf]  ;;  %v1305_v57 = vld [vmem:[%s2010_s17 + $0xc] sm:$0xf0]  ;;  %v1222_v3 = vor.u32 %v1351_v48, %v1219_v49 }
  0x76   : > { %731 = vmatpush.bf16.msra.mxu1 %v1114_v22  ;;  %v1303_v58 = vld [vmem:[%s2010_s17 + $0x4] sm:$0xf]  ;;  %v1027_v59 = vld [vmem:[%s2010_s17 + $0x10] sm:$0xf0]  ;;  %v1283_v61 = vld [vmem:[%s2018_s8 + $0x1e8] sm:$0xf0]  ;;  %v2128_v62 = vor.u32 %v1304_v52, %v1035_v53  ;;  %v2130_v63 = vor.u32 %v1305_v57, %v1025_v54 }
  0x77   : > { %745 = vmatpush.bf16.msra.mxu2 %v1178_v23  ;;  %v1367_v60 = vld [vmem:[%s2018_s8 + $0x1e4] sm:$0xf]  ;;  %v2132_v1 = vor.u32 %v1303_v58, %v1027_v59  ;;  %v1317_v4 = vld [vmem:[%s2018_s8 + $0x54] sm:$0xf]  ;;  %v1083_v5 = vld [vmem:[%s2018_s8 + $0x58] sm:$0xf0] }
  0x78   : > { %759 = vmatpush.bf16.msra.mxu3 %v1242_v27  ;;  %v1333_v6 = vld [vmem:[%s2018_s8 + $0xd4] sm:$0xf]  ;;  %v1286_v7 = vor.u32 %v1367_v60, %v1283_v61  ;;  %v1147_v8 = vld [vmem:[%s2018_s8 + $0xd8] sm:$0xf0]  ;;  %v1086_v13 = vor.u32 %v1317_v4, %v1083_v5  ;;  %v1315_v16 = vld [vmem:[%s2018_s8 + $0x44] sm:$0xf] }
  0x79   : > { %718 = vmatpush.bf16.msra.mxu0 %v1042_v34  ;;  %v1349_v9 = vld [vmem:[%s2018_s8 + $0x154] sm:$0xf]  ;;  %v1211_v10 = vld [vmem:[%s2018_s8 + $0x158] sm:$0xf0]  ;;  %v1150_v14 = vor.u32 %v1333_v6, %v1147_v8  ;;  %v1075_v17 = vld [vmem:[%s2018_s8 + $0x48] sm:$0xf0] }
  0x7a   : > { %732 = vmatpush.bf16.msra.mxu1 %v1106_v38  ;;  %v1365_v11 = vld [vmem:[%s2018_s8 + $0x1d4] sm:$0xf]  ;;  %v1275_v12 = vld [vmem:[%s2018_s8 + $0x1d8] sm:$0xf0]  ;;  %v1214_v15 = vor.u32 %v1349_v9, %v1211_v10  ;;  %v1331_v18 = vld [vmem:[%s2018_s8 + $0xc4] sm:$0xf]  ;;  %v1078_v25 = vor.u32 %v1315_v16, %v1075_v17 }
  0x7b   : > { %746 = vmatpush.bf16.msra.mxu2 %v1170_v39  ;;  %v1278_v19 = vor.u32 %v1365_v11, %v1275_v12  ;;  %v1139_v20 = vld [vmem:[%s2018_s8 + $0xc8] sm:$0xf0]  ;;  %v1347_v21 = vld [vmem:[%s2018_s8 + $0x144] sm:$0xf]  ;;  %v1313_v28 = vld [vmem:[%s2018_s8 + $0x34] sm:$0xf] }
  0x7c   : > { %760 = vmatpush.bf16.msra.mxu3 %v1234_v44  ;;  %719 = vmatmul.bf16.vlgmr.msra.gmra.mxu0 %v2130_v63  ;;  %v1203_v22 = vld [vmem:[%s2018_s8 + $0x148] sm:$0xf0]  ;;  %v1363_v23 = vld [vmem:[%s2018_s8 + $0x1c4] sm:$0xf]  ;;  %v1142_v26 = vor.u32 %v1331_v18, %v1139_v20  ;;  %v1067_v29 = vld [vmem:[%s2018_s8 + $0x38] sm:$0xf0] }
  0x7d   : > { %767 = vmatpush.bf16.msrb.mxu0 %v1102_v45  ;;  %733 = vmatmul.bf16.vlgmr.msra.gmra.mxu1 %v2132_v1  ;;  %v1267_v24 = vld [vmem:[%s2018_s8 + $0x1c8] sm:$0xf0]  ;;  %v1206_v27 = vor.u32 %v1347_v21, %v1203_v22  ;;  %v1329_v30 = vld [vmem:[%s2018_s8 + $0xb4] sm:$0xf]  ;;  %v1131_v32 = vld [vmem:[%s2018_s8 + $0xb8] sm:$0xf0]  ;;  %v1070_v37 = vor.u32 %v1313_v28, %v1067_v29 }
  0x7e   : > { %781 = vmatpush.bf16.msrb.mxu1 %v1166_v50  ;;  %747 = vmatmul.bf16.vlgmr.msra.gmra.mxu2 %v2121_v56  ;;  %v1270_v31 = vor.u32 %v1363_v23, %v1267_v24  ;;  %v1345_v33 = vld [vmem:[%s2018_s8 + $0x134] sm:$0xf]  ;;  %v1195_v34 = vld [vmem:[%s2018_s8 + $0x138] sm:$0xf0]  ;;  %v1134_v38 = vor.u32 %v1329_v30, %v1131_v32  ;;  %v1311_v40 = vld [vmem:[%s2018_s8 + $0x24] sm:$0xf] }
  0x7f   : > { %795 = vmatpush.bf16.msrb.mxu2 %v1230_v51  ;;  %761 = vmatmul.bf16.vlgmr.msra.gmra.mxu3 %v2128_v62  ;;  %v1361_v35 = vld [vmem:[%s2018_s8 + $0x1b4] sm:$0xf]  ;;  %v1259_v36 = vld [vmem:[%s2018_s8 + $0x1b8] sm:$0xf0]  ;;  %v1198_v39 = vor.u32 %v1345_v33, %v1195_v34  ;;  %v1059_v41 = vld [vmem:[%s2018_s8 + $0x28] sm:$0xf0] }
  0x80   : > { %809 = vmatpush.bf16.msrb.mxu3 %v1294_v55  ;;  %v1327_v42 = vld [vmem:[%s2018_s8 + $0xa4] sm:$0xf]  ;;  %v1262_v43 = vor.u32 %v1361_v35, %v1259_v36  ;;  %v1123_v44 = vld [vmem:[%s2018_s8 + $0xa8] sm:$0xf0]  ;;  %v1062_v49 = vor.u32 %v1311_v40, %v1059_v41  ;;  %v1309_v52 = vld [vmem:[%s2018_s8 + $0x14] sm:$0xf] }
  0x81   : > { %768 = vmatpush.bf16.msrb.mxu0 %v1094_v0  ;;  %v1343_v45 = vld [vmem:[%s2018_s8 + $0x124] sm:$0xf]  ;;  %v1187_v46 = vld [vmem:[%s2018_s8 + $0x128] sm:$0xf0]  ;;  %v1126_v50 = vor.u32 %v1327_v42, %v1123_v44  ;;  %v1051_v53 = vld [vmem:[%s2018_s8 + $0x18] sm:$0xf0] }
  0x82   : > { %782 = vmatpush.bf16.msrb.mxu1 %v1158_v2  ;;  %v1359_v47 = vld [vmem:[%s2018_s8 + $0x1a4] sm:$0xf]  ;;  %v1251_v48 = vld [vmem:[%s2018_s8 + $0x1a8] sm:$0xf0]  ;;  %v1190_v51 = vor.u32 %v1343_v45, %v1187_v46  ;;  %v1325_v54 = vld [vmem:[%s2018_s8 + $0x94] sm:$0xf]  ;;  %v1054_v0 = vor.u32 %v1309_v52, %v1051_v53 }
  0x83   : > { %796 = vmatpush.bf16.msrb.mxu2 %v1222_v3  ;;  %v1254_v55 = vor.u32 %v1359_v47, %v1251_v48  ;;  %v1115_v57 = vld [vmem:[%s2018_s8 + $0x98] sm:$0xf0]  ;;  %v1341_v58 = vld [vmem:[%s2018_s8 + $0x114] sm:$0xf]  ;;  %v1307_v4 = vld [vmem:[%s2018_s8 + $0x4] sm:$0xf] }
  0x84   : > { %810 = vmatpush.bf16.msrb.mxu3 %v1286_v7  ;;  %v1179_v59 = vld [vmem:[%s2018_s8 + $0x118] sm:$0xf0]  ;;  %v1357_v60 = vld [vmem:[%s2018_s8 + $0x194] sm:$0xf]  ;;  %v1118_v2 = vor.u32 %v1325_v54, %v1115_v57  ;;  %v1043_v5 = vld [vmem:[%s2018_s8 + $0x8] sm:$0xf0] }
  0x85   : > { %769 = vmatpush.bf16.msrb.mxu0 %v1086_v13  ;;  %v1243_v61 = vld [vmem:[%s2018_s8 + $0x198] sm:$0xf0]  ;;  %v1182_v3 = vor.u32 %v1341_v58, %v1179_v59  ;;  %v1323_v6 = vld [vmem:[%s2018_s8 + $0x84] sm:$0xf]  ;;  %v1107_v8 = vld [vmem:[%s2018_s8 + $0x88] sm:$0xf0]  ;;  %v1046_v13 = vor.u32 %v1307_v4, %v1043_v5 }
  0x86   : > { %783 = vmatpush.bf16.msrb.mxu1 %v1150_v14  ;;  %v1246_v7 = vor.u32 %v1357_v60, %v1243_v61  ;;  %v1339_v9 = vld [vmem:[%s2018_s8 + $0x104] sm:$0xf]  ;;  %v1171_v10 = vld [vmem:[%s2018_s8 + $0x108] sm:$0xf0]  ;;  %v1110_v14 = vor.u32 %v1323_v6, %v1107_v8  ;;  %v299_v23 = vld [vmem:[#allocation2 + $0x10] sm:$0xff]  ;;  %p1295_p11 = scmp.ne.s32.totalorder %s1745_s21, 1 }
  0x87   : > { %797 = vmatpush.bf16.msrb.mxu2 %v1214_v15  ;;  %v1355_v11 = vld [vmem:[%s2018_s8 + $0x184] sm:$0xf]  ;;  %v1235_v12 = vld [vmem:[%s2018_s8 + $0x188] sm:$0xf0]  ;;  %v1174_v15 = vor.u32 %v1339_v9, %v1171_v10  ;;  %v301_v30 = vld [vmem:[#allocation2 + $0x18] sm:$0xff] }
  0x88   : > { %811 = vmatpush.bf16.msrb.mxu3 %v1278_v19  ;;  %v1238_v16 = vor.u32 %v1355_v11, %v1235_v12  ;;  %v302_v45 = vld [vmem:[#allocation2 + $0x8] sm:$0xff] }
  0x89   : > { %770 = vmatpush.bf16.msrb.mxu0 %v1078_v25 }
  0x8a   : > { %784 = vmatpush.bf16.msrb.mxu1 %v1142_v26 }
  0x8b   : > { %798 = vmatpush.bf16.msrb.mxu2 %v1206_v27 }
  0x8c   : > { %812 = vmatpush.bf16.msrb.mxu3 %v1270_v31 }
  0x8d   : > { %771 = vmatpush.bf16.msrb.mxu0 %v1070_v37  ;;  %v300_v37 = vld [vmem:[#allocation2] sm:$0xff] }
  0x8e   : > { %785 = vmatpush.bf16.msrb.mxu1 %v1134_v38 }
  0x8f   : > { %799 = vmatpush.bf16.msrb.mxu2 %v1198_v39 }
  0x90   : > { %813 = vmatpush.bf16.msrb.mxu3 %v1262_v43 }
  0x91   : > { %772 = vmatpush.bf16.msrb.mxu0 %v1062_v49 }
  0x92   : > { %786 = vmatpush.bf16.msrb.mxu1 %v1126_v50 }
  0x93   : > { %800 = vmatpush.bf16.msrb.mxu2 %v1190_v51 }
  0x94   : > { %814 = vmatpush.bf16.msrb.mxu3 %v1254_v55 }
  0x95   : > { %773 = vmatpush.bf16.msrb.mxu0 %v1054_v0 }
  0x96   : > { %787 = vmatpush.bf16.msrb.mxu1 %v1118_v2 }
  0x97   : > { %801 = vmatpush.bf16.msrb.mxu2 %v1182_v3 }
  0x98   : > { %815 = vmatpush.bf16.msrb.mxu3 %v1246_v7 }
  0x99   : > { %774 = vmatpush.bf16.msrb.mxu0 %v1046_v13 }
  0x9a   : > { %788 = vmatpush.bf16.msrb.mxu1 %v1110_v14 }
  0x9b   : > { %802 = vmatpush.bf16.msrb.mxu2 %v1174_v15 }
  0x9c   : > { %816 = vmatpush.bf16.msrb.mxu3 %v1238_v16  ;;  %775 = vmatmul.bf16.vlgmr.msrb.gmra.mxu0 %v2130_v63 }
  0x9d   : > { %789 = vmatmul.bf16.vlgmr.msrb.gmra.mxu1 %v2132_v1 }
  0x9e   : > { %803 = vmatmul.bf16.vlgmr.msrb.gmra.mxu2 %v2121_v56 }
  0x9f   : > { %817 = vmatmul.bf16.vlgmr.msrb.gmra.mxu3 %v2128_v62 }
  0xf9   : > { %v720_v17 = vpop.f32.mrf.mxu0 }
  0xfa   : > { %v734_v18 = vpop.f32.mrf.mxu1 }
  0xfb   : > { %v735_v19 = vadd.f32 %v734_v18, %v720_v17 }
 0x101   : > { %v748_v20 = vpop.f32.mrf.mxu2  ;;  %v722_v25 = vpop.f32.mrf.mxu0 }
 0x102   : > { %v749_v21 = vadd.f32 %v748_v20, %v735_v19  ;;  %v762_v22 = vpop.f32.mrf.mxu3  ;;  %v736_v26 = vpop.f32.mrf.mxu1 }
 0x103   : > { %v737_v28 = vadd.f32 %v736_v26, %v722_v25 }
 0x104   : > { %v763_v24 = vadd.f32 %v762_v22, %v749_v21 }
 0x106   : > { %v823_v27 = vadd.f32 %v763_v24, %v299_v23 }
 0x108   : > { %827 = vst [vmem:[#allocation2 + $0x10] sm:$0xff] %v823_v27 }
 0x109   : > { %v750_v63 = vpop.f32.mrf.mxu2 }
 0x10a   : > { %v751_v29 = vadd.f32 %v750_v63, %v737_v28  ;;  %v764_v1 = vpop.f32.mrf.mxu3 }
 0x10c   : > { %v765_v56 = vadd.f32 %v764_v1, %v751_v29 }
 0x10e   : > { %v825_v31 = vadd.f32 %v765_v56, %v301_v30 }
 0x110   : > { %829 = vst [vmem:[#allocation2 + $0x18] sm:$0xff] %v825_v31 }
 0x119   : > { %v776_v62 = vpop.f32.mrf.mxu0 }
 0x11a   : > { %v790_v32 = vpop.f32.mrf.mxu1 }
 0x11b   : > { %v791_v33 = vadd.f32 %v790_v32, %v776_v62 }
 0x121   : > { %v804_v34 = vpop.f32.mrf.mxu2  ;;  %v778_v39 = vpop.f32.mrf.mxu0 }
 0x122   : > { %v805_v35 = vadd.f32 %v804_v34, %v791_v33  ;;  %v818_v36 = vpop.f32.mrf.mxu3  ;;  %v792_v40 = vpop.f32.mrf.mxu1 }
 0x123   : > { %v793_v42 = vadd.f32 %v792_v40, %v778_v39 }
 0x124   : > { %v819_v38 = vadd.f32 %v818_v36, %v805_v35 }
 0x126   : > { %v824_v41 = vadd.f32 %v819_v38, %v300_v37 }
 0x128   : > { %828 = vst [vmem:[#allocation2] sm:$0xff] %v824_v41 }
 0x129   : > { %v806_v43 = vpop.f32.mrf.mxu2 }
 0x12a   : > { %v807_v44 = vadd.f32 %v806_v43, %v793_v42  ;;  %v820_v46 = vpop.f32.mrf.mxu3 }
 0x12c   : > { %v821_v47 = vadd.f32 %v820_v46, %v807_v44  ;;  %834 = sbr.rel (%p1295_p11) target bundleno = 317 (0x13d), region = 52 }
 0x12e   : > { %v826_v48 = vadd.f32 %v821_v47, %v302_v45 }
 0x130   : > { %830 = vst [vmem:[#allocation2 + $0x8] sm:$0xff] %v826_v48 }
 0x131   : > { %v835_v49 = vld [vmem:[#allocation2 + $0x10] sm:$0xff]  ;;  %v839_v50 = vld [vmem:[%s2028_s28] sm:$0x3]  ;;  %v837_v54 = vld [vmem:[#allocation2 + $0x18] sm:$0xff] }
 0x132   : > { %v836_v51 = vld [vmem:[#allocation2] sm:$0xff]  ;;  %v841_v52 = vperm.slane %v839_v50, 0  ;;  %v842_v53 = vperm.slane %v839_v50, 1 }
 0x134   : > { %v845_v57 = vadd.f32 %v841_v52, %v835_v49  ;;  %v846_v58 = vadd.f32 %v842_v53, %v836_v51  ;;  %v847_v59 = vadd.f32 %v841_v52, %v837_v54 }
 0x136   : > { %v849_v61 = vmax.f32 %v845_v57, 0.0  ;;  %v850_v0 = vmax.f32 %v846_v58, 0.0  ;;  %v851_v2 = vmax.f32 %v847_v59, 0.0 }
 0x137   : > { %v838_v55 = vld [vmem:[#allocation2 + $0x8] sm:$0xff] }
 0x138   : > { %v848_v60 = vadd.f32 %v842_v53, %v838_v55  ;;  %853 = vst [vmem:[%s2035_s1] sm:$0xff] %v849_v61 }
 0x139   : > { %854 = vst [vmem:[%s2035_s1 + $0x8] sm:$0xff] %v850_v0 }
 0x13a   : > { %v852_v3 = vmax.f32 %v848_v60, 0.0  ;;  %855 = vst [vmem:[%s2035_s1 + $0x10] sm:$0xff] %v851_v2 }
 0x13c   : > { %856 = vst [vmem:[%s2035_s1 + $0x18] sm:$0xff] %v852_v3 }
 0x13d PF: > { %s1371_s17 = sshll.u32 %s1749_s22, 4  ;;  %s2301_s5 = sld [smem:[#allocation24_spill]] }
 0x13e   : > { %s870_s29 = sshll.u32 %s2035_s1, 4  ;;  %s858_s10 = scalar_lea.sflag [#allocation5], %s2025_s24  ;;  %s871_s29 = int_to_ptr.vmem [resolvable:$true] %s870_s29 }
 0x143   : > { %s869_s15 = scalar_lea.hbm %s2301_s5, %s1371_s17  ;;  %s1627_s22 = scalar_lea.hbm %s2301_s5, 64 }
 0x144   : > { %s872_s26 = sshll.u32 %s869_s15, 4  ;;  %s873_s26 = int_to_ptr.hbm [resolvable:$true] %s872_s26 }
 0x145   : > { %s1621_s3 = sshra.s32 %s873_s26, 4  ;;  %s1622_s3 = int_to_ptr.hbm [resolvable:$true] %s1621_s3 }
 0x146   : > { %s1623_s6 = scalar_lea.hbm %s1622_s3, 32  ;;  %p1628_p10 = scmp.lt.s32.totalorder %s1622_s3, %s2301_s5 }
 0x147   : > { %p1624_p3 = scmp.ne.s32.totalorder %s1622_s3, %s1623_s6  ;;  %p1629_p12 = scmp.lt.s32.totalorder %s1627_s22, %s1623_s6 }
 0x149   : > { %p1625_p5 = pnand %p1624_p3, %p1989_p4  ;;  %p1630_p6 = por %p1629_p12, %p1628_p10 }
 0x14b   : > { %p1626_p8 = pneg %p1625_p5 }
 0x14d   : > { %p1631_p13 = pnand %p1630_p6, %p1626_p8 }
 0x14f   : > { %1634 = shalt.err (!%p1631_p13)
}
 0x150   : > { %s1769_s8 = smov 256   ;;  %s1770_s24 = smov 512  }
 0x151   : > { %s1771_s30 = smov 16  }
 0x152   : > { %1378 = dma.vmem_to_hbm [thread:$0]  (%p1989_p4), %s871_s29, 512, %s873_s26, %s858_s10, %s1769_s8, %s1770_s24, %s1771_s30  }
 0x153 PF: > { %p1395_p0 = scmp.ge.s32.totalorder %s1761_s25, 2  ;;  %s887_s28 = sand.u32 1, %s1709_s12  }
 0x154   : > { %s888_s9 = scalar_lea.sflag [#allocation5], %s887_s28 }
 0x155   : > { %p1391_p2 = pnand %p1395_p0, %p1993_p9 }
 0x157   : > { %p1392_p1 = pneg %p1391_p2 }
 0x159   : > { %1704 = dma.done.wait (%p1392_p1), %s888_s9, 512  }
 0x15a   : > { %1706 = vsyncadd (%p1392_p1), %s888_s9, 4294966784  ;;  %s22_s25 = sadd.s32 1, %s1761_s25   ;;  %s2303_s4 = sld [smem:[#allocation14_spill]] }
 0x15b   : > { %p2217_p7 = scmp.ge.s32.totalorder %s22_s25, 6   ;;  %s2304_s17 = sld [smem:[#allocation21_spill]] }
 0x15c   : > { %s2305_s21 = sld [smem:[#allocation15_spill]]  ;;  %s2311_s12 = smov %s1713_s13 }
 0x15d   : > { %s2306_s20 = sld [smem:[#allocation19_spill]]  ;;  %s2312_s13 = smov %s1717_s14 }
 0x15e   : > { %s2307_s11 = sld [smem:[#allocation16_spill]]  ;;  %s2313_s14 = smov %s1966_s18 }
 0x15f   : > { %s2308_s22 = sld [smem:[#allocation17_spill]]  ;;  %s2314_s15 = smov %s1725_s16 }
 0x160   : > { %s2309_s23 = sld [smem:[#allocation18_spill]]  ;;  %s2315_s16 = smov %s2303_s4 }
 0x161   : > { %s2310_s24 = sld [smem:[#allocation20_spill]]  ;;  %s2316_s18 = smov %s1737_s19 }
 0x162   : > { %s2317_s19 = smov %s2305_s21  ;;  %21 = sbr.rel (!%p2217_p7) target bundleno = 16 (0x10), region = 109 }
 0x164   : > { %s2318_s21 = smov %s2307_s11 }
 0x167   :  { %894 = vsyncpa [#allocation4], 1 }
 0x168   :  { %896 = vsyncpa [#allocation4 + $0x1], 1 }
 0x169   :  { %897 = vsyncpa [#allocation7], 1 }
 0x16a   :  { %899 = vsyncpa [#allocation7 + $0x1], 1 }
 0x16b   :  { %900 = vsyncpa [#allocation5], 1 }
 0x16c   :  { %902 = vsyncpa [#allocation5 + $0x1], 1 }

</bundles_post_ra>
